<compile_context>
chip_gen: v7x
topology: tpu7x:2x2x1
jax: 0.10.0
libtpu: 0.0.40
codegen_flags: <defaults>
</compile_context>

<pallas_src>
import functools

import jax
import jax.numpy as jnp
from jax import lax
from jax.experimental import pallas as pl
from jax.experimental.pallas import tpu as pltpu


def _round_up(n, m):
    return ((n + m - 1) // m) * m


def _block_policy_kernel(x_ref, w_ref, b_ref, o_ref, *, o_valid, o_padded):
    # Cast MXU operands to bf16 inside the kernel (no extra HBM pass for x/W).
    x = x_ref[...].astype(jnp.bfloat16)
    w = w_ref[...].astype(jnp.bfloat16)
    # Linear: (TM, D) @ (D, O') with f32 accumulation on the MXU.
    z = jnp.dot(x, w, preferred_element_type=jnp.float32)
    z = z + b_ref[...]                       # bias in f32
    z = jnp.maximum(z, 0.0)                  # ReLU
    if o_padded != o_valid:
        # Lane-padding columns must not contribute to the softmax.
        col = lax.broadcasted_iota(jnp.int32, z.shape, dimension=1)
        z = jnp.where(col < o_valid, z, -1e30)
    # Numerically stable softmax over the last dim, all in f32.
    m = jnp.max(z, axis=-1, keepdims=True)
    e = jnp.exp(z - m)
    s = jnp.sum(e, axis=-1, keepdims=True)
    inv = pl.reciprocal(s, approx=True)      # EUP vrcp, off the VPU path
    o_ref[...] = (e * inv).astype(o_ref.dtype)


def block_policy_forward(x, w_t, b, *, tm=1024, out_dtype=jnp.float32,
                         core_parallel=False,
                         vmem_budget_bytes=32 * 1024 * 1024):
    """x: (B, D), w_t: (D, O) (transposed Linear weight), b: (O,).

    Returns softmax(relu(x @ w_t + b), axis=-1) with dtype `out_dtype`.
    """
    B, D = x.shape
    O = w_t.shape[1]
    O_pad = _round_up(O, 128)                # lane-dense output stores

    if O_pad != O:
        # Small one-time pads of the (tiny) parameters; padded columns are
        # masked to -inf inside the kernel and produce ~0 probability.
        w_t = jnp.pad(w_t, ((0, 0), (0, O_pad - O)))
        b = jnp.pad(b, (0, O_pad - O))
    b2d = b.reshape(1, O_pad).astype(jnp.float32)

    x_itemsize = jnp.dtype(x.dtype).itemsize
    out_itemsize = jnp.dtype(out_dtype).itemsize
    w_itemsize = jnp.dtype(w_t.dtype).itemsize

    # --- batch tile selection against a VMEM budget (conservative: assume the
    # pipeline double-buffers every operand, including the resident weight).
    fixed_bytes = 2 * (D * O_pad * w_itemsize + O_pad * 4)
    per_row_bytes = 2 * (D * x_itemsize + O_pad * out_itemsize)
    tm_budget = max(16, (vmem_budget_bytes - fixed_bytes) // max(per_row_bytes, 1))
    # TODO(synk): if the resident (D, O) weight alone blows v7x's 64 MiB VMEM,
    # add a K-reduction grid axis ("arbitrary") with a (tm, O) f32 accumulator
    # instead of holding the full weight resident.
    tm_eff = min(int(tm), int(tm_budget))
    tm_eff = max(16, (tm_eff // 16) * 16)    # bf16 sublane packing: 16-row align
    if B <= tm_eff:
        tm_eff = B                           # single block == full batch dim
    grid = (pl.cdiv(B, tm_eff),)             # ragged last block: OOB writes masked

    # Only raise the scoped VMEM limit when needed (v5e default is 16 MiB).
    est_vmem = fixed_bytes + tm_eff * per_row_bytes
    vmem_limit = None
    if est_vmem * 2 > 16 * 1024 * 1024:
        vmem_limit = int(min(64 * 1024 * 1024, est_vmem * 2))

    dim_sem = (pltpu.CORE_PARALLEL,) if core_parallel else ("parallel",)

    cost = pl.CostEstimate(
        flops=2 * B * D * O_pad,
        transcendentals=B * O_pad,
        bytes_accessed=(B * D * x_itemsize
                        + D * O_pad * w_itemsize
                        + O_pad * 4
                        + B * O_pad * out_itemsize),
    )

    out = pl.pallas_call(
        functools.partial(_block_policy_kernel, o_valid=O, o_padded=O_pad),
        out_shape=jax.ShapeDtypeStruct((B, O_pad), out_dtype),
        grid_spec=pltpu.PrefetchScalarGridSpec(
            num_scalar_prefetch=0,
            grid=grid,
            in_specs=[
                pl.BlockSpec((tm_eff, D), lambda i: (i, 0)),    # x: streamed per tile
                pl.BlockSpec((D, O_pad), lambda i: (0, 0)),     # W: VMEM-resident
                pl.BlockSpec((1, O_pad), lambda i: (0, 0)),     # b: VMEM-resident
            ],
            out_specs=pl.BlockSpec((tm_eff, O_pad), lambda i: (i, 0)),
        ),
        compiler_params=pltpu.CompilerParams(
            dimension_semantics=dim_sem,
            vmem_limit_bytes=vmem_limit,
        ),
        cost_estimate=cost,
    )(x, w_t, b2d)

    # Only slice if we lane-padded O (padded probabilities are ~0 anyway).
    return out[:, :O] if O_pad != O else out


def init_block_policy_params(key, input_dim, output_dim):
    """Deterministic init mimicking nn.Linear default (uniform +/- 1/sqrt(fan_in))."""
    kw, kb = jax.random.split(key)
    bound = 1.0 / (input_dim ** 0.5)
    w = jax.random.uniform(kw, (output_dim, input_dim), jnp.float32, -bound, bound)
    b = jax.random.uniform(kb, (output_dim,), jnp.float32, -bound, bound)
    return w, b


def _reference(x, w, b):
    # bf16-matched reference (same operand rounding as the MXU path).
    x_bf = x.astype(jnp.bfloat16).astype(jnp.float32)
    w_bf = w.astype(jnp.bfloat16).astype(jnp.float32)
    return jax.nn.softmax(jax.nn.relu(x_bf @ w_bf.T + b), axis=-1)


if __name__ == "__main__":
    key = jax.random.PRNGKey(0)
    k_x, k_p, k_x2, k_p2 = jax.random.split(key, 4)

    # --- case 1: small shapes consistent with the module (lane-aligned O).
    batch, input_dim, output_dim = 8, 32, 128
    x = jax.random.normal(k_x, (batch, input_dim), jnp.float32)
    w, b = init_block_policy_params(k_p, input_dim, output_dim)

    out = block_policy_forward(x, w.T, b)            # kernel expects (D, O) weight
    out = jax.block_until_ready(out)

    ref_bf = _reference(x, w, b)
    ref_f32 = jax.nn.softmax(jax.nn.relu(x @ w.T + b), axis=-1)
    assert out.shape == (batch, output_dim)
    assert jnp.allclose(out, ref_bf, atol=3e-3, rtol=3e-3)
    assert jnp.allclose(out, ref_f32, atol=3e-2)
    assert jnp.allclose(jnp.sum(out, axis=-1), 1.0, atol=5e-3)

    # --- case 2: non-multiple-of-128 policy head (exercises lane padding +
    # in-kernel -inf masking) and a ragged batch grid (exercises OOB masking).
    batch2, output_dim2 = 40, 100
    x2 = jax.random.normal(k_x2, (batch2, input_dim), jnp.float32)
    w2, b2 = init_block_policy_params(k_p2, input_dim, output_dim2)

    out2 = block_policy_forward(x2, w2.T, b2, tm=16)  # grid = cdiv(40, 16) = 3
    out2 = jax.block_until_ready(out2)

    ref2 = _reference(x2, w2, b2)
    assert out2.shape == (batch2, output_dim2)
    assert jnp.allclose(out2, ref2, atol=3e-3, rtol=3e-3)
    assert jnp.allclose(jnp.sum(out2, axis=-1), 1.0, atol=5e-3)

    print("KERNEL_OK")
</pallas_src>

<mosaic_0001>
module attributes {stable_mosaic.version = 11 : i64} {
  func.func @_block_policy_kernel(%arg0: i32, %arg1: memref<8x32xf32, #tpu.memory_space<vmem>>, %arg2: memref<32x128xf32, #tpu.memory_space<vmem>>, %arg3: memref<1x128xf32, #tpu.memory_space<vmem>>, %arg4: memref<8x128xf32, #tpu.memory_space<vmem>>) attributes {dimension_semantics = [#tpu.dimension_semantics<parallel>], iteration_bounds = array<i64: 1>, scalar_prefetch = 0 : i64, scratch_operands = 0 : i64, tpu.core_type = #tpu.core_type<tc>, window_params = [{transform_indices = @transform_0, window_bounds = array<i64: 8, 32>}, {pipeline_mode = #tpu.pipeline_mode<synchronous>, transform_indices = @transform_1, window_bounds = array<i64: 32, 128>}, {pipeline_mode = #tpu.pipeline_mode<synchronous>, transform_indices = @transform_2, window_bounds = array<i64: 1, 128>}, {transform_indices = @transform_3, window_bounds = array<i64: 8, 128>}]} {
    %c0 = arith.constant 0 : index
    %c0_0 = arith.constant 0 : index
    %0 = vector.load %arg1[%c0, %c0_0] : memref<8x32xf32, #tpu.memory_space<vmem>>, vector<8x32xf32>
    %1 = arith.truncf %0 : vector<8x32xf32> to vector<8x32xbf16>
    %c0_1 = arith.constant 0 : index
    %c0_2 = arith.constant 0 : index
    %2 = vector.load %arg2[%c0_1, %c0_2] : memref<32x128xf32, #tpu.memory_space<vmem>>, vector<32x128xf32>
    %3 = arith.truncf %2 : vector<32x128xf32> to vector<32x128xbf16>
    %cst = arith.constant dense<0.000000e+00> : vector<8x128xf32>
    %4 = tpu.matmul %1, %3, %cst {dimension_numbers = #tpu.dot_dimension_numbers<[1], [0], [0], [1], [0, 0, 1, 1], [], []>} : vector<8x32xbf16>, vector<32x128xbf16>, vector<8x128xf32> -> vector<8x128xf32>
    %c0_3 = arith.constant 0 : index
    %c0_4 = arith.constant 0 : index
    %5 = vector.load %arg3[%c0_3, %c0_4] : memref<1x128xf32, #tpu.memory_space<vmem>>, vector<1x128xf32>
    %6 = vector.broadcast %5 : vector<1x128xf32> to vector<8x128xf32>
    %7 = arith.addf %4, %6 : vector<8x128xf32>
    %cst_5 = arith.constant 0.000000e+00 : f32
    %8 = vector.broadcast %cst_5 : f32 to vector<8x128xf32>
    %9 = arith.maximumf %7, %8 : vector<8x128xf32>
    %cst_6 = arith.constant dense<0xFF800000> : vector<8xf32>
    %10 = vector.multi_reduction <maximumf>, %9, %cst_6 [1] : vector<8x128xf32> to vector<8xf32>
    %11 = vector.shape_cast %10 : vector<8xf32> to vector<8x1xf32>
    %12 = vector.broadcast %11 : vector<8x1xf32> to vector<8x128xf32>
    %13 = arith.subf %9, %12 : vector<8x128xf32>
    %14 = math.exp %13 : vector<8x128xf32>
    %cst_7 = arith.constant dense<0.000000e+00> : vector<8xf32>
    %15 = vector.multi_reduction <add>, %14, %cst_7 [1] : vector<8x128xf32> to vector<8xf32>
    %16 = vector.shape_cast %15 : vector<8xf32> to vector<8x1xf32>
    %17 = tpu.reciprocal %16 {approx = true} : vector<8x1xf32> -> vector<8x1xf32>
    %18 = vector.broadcast %17 : vector<8x1xf32> to vector<8x128xf32>
    %19 = arith.mulf %14, %18 : vector<8x128xf32>
    %c0_8 = arith.constant 0 : index
    %c0_9 = arith.constant 0 : index
    %20 = vector.load %arg4[%c0_8, %c0_9] : memref<8x128xf32, #tpu.memory_space<vmem>>, vector<8x128xf32>
    tpu.vector_store %arg4[%c0_8, %c0_9], %19 {strides = array<i32>} : memref<8x128xf32, #tpu.memory_space<vmem>>, vector<8x128xf32>,
    return
  }
  func.func @transform_0(%arg0: i32) -> (i32, i32) {
    %c0_i32 = arith.constant 0 : i32
    %c0_i32_0 = arith.constant 0 : i32
    return %arg0, %c0_i32 : i32, i32
  }
  func.func @transform_1(%arg0: i32) -> (i32, i32) {
    %c0_i32 = arith.constant 0 : i32
    %c0_i32_0 = arith.constant 0 : i32
    %c0_i32_1 = arith.constant 0 : i32
    return %c0_i32, %c0_i32_0 : i32, i32
  }
  func.func @transform_2(%arg0: i32) -> (i32, i32) {
    %c0_i32 = arith.constant 0 : i32
    %c0_i32_0 = arith.constant 0 : i32
    %c0_i32_1 = arith.constant 0 : i32
    return %c0_i32, %c0_i32_0 : i32, i32
  }
  func.func @transform_3(%arg0: i32) -> (i32, i32) {
    %c0_i32 = arith.constant 0 : i32
    %c0_i32_0 = arith.constant 0 : i32
    return %arg0, %c0_i32 : i32, i32
  }
}

</mosaic_0001>

<bundles_post_ra>
// kernel: tpu_custom_call.1
= control target key start
LH: loop header
LB: loop body
LE: loop exit
PB: predicated region body
PF: predicated region fallthrough
CT: control target
= control target key end

     0   :  { %8 = vsyncpa [#allocation3], 0  ;;  %s297_s0 = inlined_call_operand.hbm [shape: f32[8,32], index: 0, kind: input, shape index: {}]   ;;  %s298_s1 = inlined_call_operand.hbm [shape: f32[32,128], index: 1, kind: input, shape index: {}]   ;;  %s299_s2 = inlined_call_operand.vmem [shape: f32[1,128], index: 2, kind: input, shape index: {}]   ;;  %s300_s3 = inlined_call_operand.hbm [shape: f32[8,128], index: 3, kind: output, shape index: {}]  }
   0x1   :  { %9 = vsyncpa [#allocation6], 0 }
   0x2   :  { %10 = vsyncpa [#allocation4], 0  ;;  %s224_s12 = smov [#allocation2]   ;;  %s225_s14 = smov [#allocation5]  }
   0x3   :  { %s17_s13 = sshll.u32 %s224_s12, 4  ;;  %s26_s15 = sshll.u32 %s225_s14, 4  ;;  %s18_s13 = int_to_ptr.vmem [resolvable:$true] %s17_s13  ;;  %s251_s15 = int_to_ptr.vmem [resolvable:$true] %s26_s15 }
   0x4   :  { %s152_s18 = scalar_lea.hbm %s297_s0, 128 }
   0x5   :  { %p153_p0 = scmp.ne.s32.totalorder %s297_s0, %s152_s18  ;;  %p156_p1 = scmp.lt.u32.totalorder %s152_s18, %s297_s0 }
   0x7   :  { %p158_p2 = pnand %p156_p1, %p153_p0 }
   0x9   :  { %161 = shalt.err (!%p158_p2)
}
   0xa   :  { %s162_s23 = scalar_lea.vmem %s18_s13, 128  ;;  %p167_p4 = scmp.lt.s32.totalorder %s18_s13, %s18_s13 }
   0xb   :  { %p163_p3 = scmp.ne.s32.totalorder %s18_s13, %s162_s23  ;;  %p168_p5 = scmp.lt.s32.totalorder %s162_s23, %s162_s23 }
   0xd   :  { %p169_p6 = por %p168_p5, %p167_p4 }
   0xf   :  { %p170_p7 = pnand %p169_p6, %p163_p3 }
  0x11   :  { %173 = shalt.err (!%p170_p7)
}
  0x12   :  { %20 = dma.hbm_to_vmem [thread:$0]  %s297_s0, 128, %s18_s13, [#allocation3]  }
  0x13   :  { %s174_s28 = scalar_lea.hbm %s298_s1, 512 }
  0x14   :  { %p175_p8 = scmp.ne.s32.totalorder %s298_s1, %s174_s28  ;;  %p178_p9 = scmp.lt.u32.totalorder %s174_s28, %s298_s1 }
  0x16   :  { %p180_p10 = pnand %p178_p9, %p175_p8 }
  0x18   :  { %183 = shalt.err (!%p180_p10)
}
  0x19   :  { %s184_s6 = scalar_lea.vmem %s251_s15, 512  ;;  %p189_p12 = scmp.lt.s32.totalorder %s251_s15, %s251_s15 }
  0x1a   :  { %p185_p11 = scmp.ne.s32.totalorder %s251_s15, %s184_s6  ;;  %p190_p13 = scmp.lt.s32.totalorder %s184_s6, %s184_s6 }
  0x1c   :  { %p191_p0 = por %p190_p13, %p189_p12 }
  0x1e   :  { %p192_p1 = pnand %p191_p0, %p185_p11 }
  0x20   :  { %195 = shalt.err (!%p192_p1)
}
  0x21   :  { %s226_s0 = smov 128   ;;  %s227_s7 = smov 8  }
  0x22   :  { %32 = dma.hbm_to_vmem [thread:$0]  %s298_s1, 512, %s251_s15, [#allocation6], %s226_s0, %s226_s0, %s227_s7  }
  0x23   :  { %218 = dma.done.wait [#allocation3], 128  }
  0x24   :  { %219 = vsyncadd [#allocation3], 4294967168 }
  0x25   :  { %220 = dma.done.wait [#allocation6], 512  }
  0x26   :  { %221 = vsyncadd [#allocation6], 4294966784  ;;  %v228_v0 = vmov 0.0   ;;  %vm229_vm0 = vmmov 0   ;;  %v44_v1 = vld [vmem:[#allocation5] sm:$0xff]  ;;  %v45_v2 = vld [vmem:[#allocation5 + $0x8] sm:$0xff] }
  0x27   :  { %133 = vmatprep.subr.bf16.mxu0 %v228_v0  ;;  %137 = vmatprep.mubr.msk.bf16.mxu0 %vm229_vm0, %v228_v0  ;;  %v46_v3 = vld [vmem:[#allocation5 + $0x10] sm:$0xff]  ;;  %v48_v4 = vpack.c.bf16 %v45_v2, %v44_v1  ;;  %v47_v5 = vld [vmem:[#allocation5 + $0x18] sm:$0xff]  ;;  %vm57_vm1 = vcmask 261120   ;;  %s230_s11 = smov [#allocation7]  }
  0x28   :  { %v49_v6 = vpack.c.bf16 %v47_v5, %v46_v3  ;;  %v42_v7 = vld [vmem:[#allocation2] sm:$0xff]  ;;  %s118_s12 = sshll.u32 %s230_s11, 4  ;;  %s119_s12 = int_to_ptr.vmem [resolvable:$true] %s118_s12 }
  0x29   :  { %134 = vmatpush3.bf16.msra.mxu0 %v48_v4  ;;  %v43_v8 = vpack.c.bf16 %v42_v7, %v42_v7  ;;  %v128_v9 = vld [vmem:[%s299_s2] ss:$0 sm:$0xff]  ;;  %s196_s2 = scalar_lea.vmem %s119_s12, 128  ;;  %p201_p3 = scmp.lt.s32.totalorder %s119_s12, %s119_s12 }
  0x2a   :  { %135 = vmatprep.subr.bf16.mxu0 %v228_v0  ;;  %p197_p2 = scmp.ne.s32.totalorder %s119_s12, %s196_s2  ;;  %p202_p4 = scmp.lt.s32.totalorder %s196_s2, %s196_s2 }
  0x2c   :  { %p203_p5 = por %p202_p4, %p201_p3 }
  0x2d   :  { %136 = vmatpush3.bf16.msra.mxu0 %v49_v6 }
  0x2e   :  { %p204_p6 = pnand %p203_p5, %p197_p2 }
  0x30   :  { %138 = vmatmul.mubr.msk.bf16.vlgmr.msra.gmra.mrb[0].mxu0 %vm57_vm1, %v43_v8 }
 0x103   :  { %v95_v10 = vpop.f32.mrb[0].mxu0 }
 0x104   :  { %v96_v11 = vadd.f32 %v128_v9, %v95_v10  ;;  %v139_v12 = vpop.f32.mrb[1].mxu0 }
 0x105   :  { %v98_v13 = vpop.f32.mrb[2].mxu0 }
 0x106   :  { %v101_v14 = vmax.f32 %v96_v11, 0.0  ;;  %v140_v15 = vpop.f32.mrb[3].mxu0 }
 0x108   :  { %102 = vmax.xlane.f32.xlu0 %v101_v14 }
 0x195   :  { %v103_v16 = vpop.xlane.xlu0 %102 }
 0x196   :  { %v104_v17 = vsub.f32 %v101_v14, %v103_v16 }
 0x198   :  { %v105_v18 = vmul.f32 1.442695, %v104_v17 }
 0x19a   :  { %148 = vpow2.f32 %v105_v18 }
 0x1a4   :  { %v149_v19 = vpop.eup %148 }
 0x1a5   :  { %107 = vadd.xlane.f32.xlu0 %v149_v19 }
 0x232   :  { %v108_v20 = vpop.xlane.xlu0 %107 }
 0x233   :  { %150 = vrcp.f32 %v108_v20 }
 0x23d   :  { %v151_v21 = vpop.eup %150 }
 0x23e   :  { %v110_v22 = vmul.f32 %v151_v21, %v149_v19 }
 0x240   :  { %111 = vst [vmem:[#allocation7] sm:$0xff] %v110_v22 }
 0x241   :  { %207 = shalt.err (!%p204_p6)
}
 0x242   :  { %s208_s15 = scalar_lea.hbm %s300_s3, 128 }
 0x243   :  { %p209_p7 = scmp.ne.s32.totalorder %s300_s3, %s208_s15  ;;  %p212_p8 = scmp.lt.u32.totalorder %s208_s15, %s300_s3 }
 0x245   :  { %p214_p9 = pnand %p212_p8, %p209_p7 }
 0x247   :  { %217 = shalt.err (!%p214_p9)
}
 0x248   :  { %121 = dma.vmem_to_hbm [thread:$0]  %s119_s12, 128, %s300_s3, [#allocation4]  }
 0x249   :  { %222 = dma.done.wait [#allocation4], 128  }
 0x24a   :  { %223 = vsyncadd [#allocation4], 4294967168 }
 0x24b   :  { %125 = vsyncpa [#allocation3], 1 }
 0x24c   :  { %126 = vsyncpa [#allocation6], 1 }
 0x24d   :  { %127 = vsyncpa [#allocation4], 1 }

</bundles_post_ra>
